<compile_context>
chip_gen: v7x
topology: tpu7x:2x2x1
jax: 0.10.0
libtpu: 0.0.40
codegen_flags: <defaults>
</compile_context>

<pallas_src>
import jax
import jax.numpy as jnp
from jax.experimental import pallas as pl
from jax.experimental.pallas import tpu as pltpu

_LANE = 128
_TARGET_IN_BYTES = 8 * 1024 * 1024    # per-step input block target
_VMEM_LIMIT = 32 * 1024 * 1024        # scoped VMEM limit (safe on v5e/v6e/v7x)
_VMEM_BUDGET = 24 * 1024 * 1024       # 2 buffers x (in + out) per step headroom


def _gated_activation_kernel(x_ref, o_ref):
    # x_ref: (bn, 2, C, T)   o_ref: (bn, C, T)
    a = x_ref[:, 0].astype(jnp.float32)   # tanh half
    b = x_ref[:, 1].astype(jnp.float32)   # sigmoid half
    # sigmoid(b) == 0.5 * tanh(0.5 * b) + 0.5  (single EUP op + cheap VPU fma)
    gate = 0.5 * jnp.tanh(0.5 * b) + 0.5
    o_ref[...] = (jnp.tanh(a) * gate).astype(o_ref.dtype)


def _choose_tiles(n, c2, hw, itemsize):
    """Pick (batch block, lane tile, #lane tiles) for the (n, 2, C, HW) layout."""
    c = c2 // 2

    # --- lane tile: multiple of 128, ragged last block handled by cdiv grid ---
    if hw <= _LANE:
        tile_hw = hw                      # full-extent last dim: always legal
    else:
        hw_pad = pl.cdiv(hw, _LANE) * _LANE
        cap = max(_LANE,
                  (_TARGET_IN_BYTES // max(1, c2 * itemsize)) // _LANE * _LANE)
        floor = 512 if itemsize >= 4 else 1024   # >= ~2 KiB strided-DMA rows
        tile_hw = max(cap, floor)
        # Never exceed the double-buffered VMEM budget: 2*(2C + C)*tile*itemsize.
        vmem_cap = max(_LANE,
                       (_VMEM_BUDGET // max(1, 6 * c * itemsize)) // _LANE * _LANE)
        tile_hw = min(tile_hw, vmem_cap, hw_pad)
    hw_tiles = pl.cdiv(hw, tile_hw)

    # --- fold batch into the block when per-step blocks are tiny ---
    in_block = c2 * tile_hw * itemsize
    bn = max(1, min(n, _TARGET_IN_BYTES // max(1, in_block)))
    # Keep at least 2 grid steps so v7x's two TensorCores both get work.
    if hw_tiles * pl.cdiv(n, bn) < 2 and n >= 2:
        bn = pl.cdiv(n, 2)
    return bn, tile_hw, hw_tiles


def gated_activation(x):
    """x: (N, 2C, H, W) -> (N, C, H, W) = tanh(x[:, :C]) * sigmoid(x[:, C:])."""
    n, c2, h, w = x.shape
    assert c2 % 2 == 0, "channel dim must be even for chunk(2, dim=1)"
    c = c2 // 2
    hw = h * w
    itemsize = jnp.dtype(x.dtype).itemsize

    bn, tile_hw, hw_tiles = _choose_tiles(n, c2, hw, itemsize)
    n_tiles = pl.cdiv(n, bn)

    # Channel halves on a leading size-2 axis (contiguous reshape, no copy).
    x4 = x.reshape(n, 2, c, hw)

    cost = pl.CostEstimate(
        flops=5 * n * c * hw,                       # 2 muls + fma + 0.5*b scale
        transcendentals=2 * n * c * hw,             # two tanh per output element
        bytes_accessed=3 * n * c * hw * itemsize,   # read 2C, write C
    )

    out_flat = pl.pallas_call(
        _gated_activation_kernel,
        out_shape=jax.ShapeDtypeStruct((n, c, hw), x.dtype),
        grid_spec=pltpu.PrefetchScalarGridSpec(
            num_scalar_prefetch=0,
            grid=(n_tiles, hw_tiles),
            in_specs=[
                pl.BlockSpec((bn, 2, c, tile_hw), lambda i, j: (i, 0, 0, j)),
            ],
            out_specs=pl.BlockSpec((bn, c, tile_hw), lambda i, j: (i, 0, j)),
        ),
        compiler_params=pltpu.CompilerParams(
            dimension_semantics=("parallel", "parallel"),
            vmem_limit_bytes=_VMEM_LIMIT,
        ),
        cost_estimate=cost,
    )(x4)

    return out_flat.reshape(n, c, h, w)


def _reference(x):
    a, b = jnp.split(x, 2, axis=1)
    return jnp.tanh(a) * jax.nn.sigmoid(b)


if __name__ == "__main__":
    key = jax.random.PRNGKey(0)

    # Primary small NCHW case (module chunks dim=1 into two halves).
    N, C2, H, W = 2, 8, 16, 16          # output: (2, 4, 16, 16)
    x = jax.random.normal(key, (N, C2, H, W), dtype=jnp.float32)
    out = jax.block_until_ready(gated_activation(x))
    ref = _reference(x)
    assert out.shape == (N, C2 // 2, H, W)
    assert jnp.allclose(out, ref, atol=1e-5, rtol=1e-5), float(
        jnp.max(jnp.abs(out - ref))
    )

    # Second case exercising the ragged (padded) lane-tile path (H*W % 128 != 0).
    x2 = jax.random.normal(jax.random.PRNGKey(1), (2, 8, 20, 20), dtype=jnp.float32)
    out2 = jax.block_until_ready(gated_activation(x2))
    ref2 = _reference(x2)
    assert jnp.allclose(out2, ref2, atol=1e-5, rtol=1e-5), float(
        jnp.max(jnp.abs(out2 - ref2))
    )

    print("KERNEL_OK")
</pallas_src>

<mosaic_0001>
module attributes {stable_mosaic.version = 11 : i64} {
  func.func @_gated_activation_kernel(%arg0: i32, %arg1: i32, %arg2: memref<1x2x4x256xf32, #tpu.memory_space<vmem>>, %arg3: memref<1x4x256xf32, #tpu.memory_space<vmem>>) attributes {dimension_semantics = [#tpu.dimension_semantics<parallel>, #tpu.dimension_semantics<parallel>], iteration_bounds = array<i64: 2, 1>, scalar_prefetch = 0 : i64, scratch_operands = 0 : i64, tpu.core_type = #tpu.core_type<tc>, window_params = [{transform_indices = @transform_0, window_bounds = array<i64: 1, 2, 4, 256>}, {transform_indices = @transform_1, window_bounds = array<i64: 1, 4, 256>}]} {
    %c0 = arith.constant 0 : index
    %c0_0 = arith.constant 0 : index
    %c0_1 = arith.constant 0 : index
    %c0_2 = arith.constant 0 : index
    %0 = vector.load %arg2[%c0, %c0_0, %c0_1, %c0_2] : memref<1x2x4x256xf32, #tpu.memory_space<vmem>>, vector<1x1x4x256xf32>
    %1 = vector.shape_cast %0 : vector<1x1x4x256xf32> to vector<1x4x256xf32>
    %c0_3 = arith.constant 0 : index
    %c1 = arith.constant 1 : index
    %c0_4 = arith.constant 0 : index
    %c0_5 = arith.constant 0 : index
    %2 = vector.load %arg2[%c0_3, %c1, %c0_4, %c0_5] : memref<1x2x4x256xf32, #tpu.memory_space<vmem>>, vector<1x1x4x256xf32>
    %3 = vector.shape_cast %2 : vector<1x1x4x256xf32> to vector<1x4x256xf32>
    %cst = arith.constant 5.000000e-01 : f32
    %4 = vector.broadcast %cst : f32 to vector<1x4x256xf32>
    %5 = arith.mulf %4, %3 : vector<1x4x256xf32>
    %6 = math.tanh %5 : vector<1x4x256xf32>
    %cst_6 = arith.constant 5.000000e-01 : f32
    %7 = vector.broadcast %cst_6 : f32 to vector<1x4x256xf32>
    %8 = arith.mulf %7, %6 : vector<1x4x256xf32>
    %cst_7 = arith.constant 5.000000e-01 : f32
    %9 = vector.broadcast %cst_7 : f32 to vector<1x4x256xf32>
    %10 = arith.addf %8, %9 : vector<1x4x256xf32>
    %11 = math.tanh %1 : vector<1x4x256xf32>
    %12 = arith.mulf %11, %10 : vector<1x4x256xf32>
    %c0_8 = arith.constant 0 : index
    %c0_9 = arith.constant 0 : index
    %c0_10 = arith.constant 0 : index
    %13 = vector.load %arg3[%c0_8, %c0_9, %c0_10] : memref<1x4x256xf32, #tpu.memory_space<vmem>>, vector<1x4x256xf32>
    tpu.vector_store %arg3[%c0_8, %c0_9, %c0_10], %12 {strides = array<i32>} : memref<1x4x256xf32, #tpu.memory_space<vmem>>, vector<1x4x256xf32>,
    return
  }
  func.func @transform_0(%arg0: i32, %arg1: i32) -> (i32, i32, i32, i32) {
    %c0_i32 = arith.constant 0 : i32
    %c0_i32_0 = arith.constant 0 : i32
    %c0_i32_1 = arith.constant 0 : i32
    return %arg0, %c0_i32, %c0_i32_0, %arg1 : i32, i32, i32, i32
  }
  func.func @transform_1(%arg0: i32, %arg1: i32) -> (i32, i32, i32) {
    %c0_i32 = arith.constant 0 : i32
    %c0_i32_0 = arith.constant 0 : i32
    return %arg0, %c0_i32, %arg1 : i32, i32, i32
  }
}

</mosaic_0001>

<bundles_post_ra>
// kernel: tpu_custom_call.1
= control target key start
LH: loop header
LB: loop body
LE: loop exit
PB: predicated region body
PF: predicated region fallthrough
CT: control target
= control target key end

     0   :  { %6 = vsyncpa [#allocation3], 0  ;;  %s654_s0 = inlined_call_operand.hbm [shape: f32[2,2,4,256], index: 0, kind: input, shape index: {}]   ;;  %s655_s1 = inlined_call_operand.hbm [shape: f32[2,4,256], index: 1, kind: output, shape index: {}]  }
   0x1   :  { %8 = vsyncpa [#allocation3 + $0x1], 0 }
   0x2   :  { %9 = vsyncpa [#allocation4], 0 }
   0x3   :  { %11 = vsyncpa [#allocation4 + $0x1], 0  ;;  %s480_s6 = smov 0   ;;  %s482_s7 = smov 0  }
   0x4   :  { %s484_s8 = smov 0   ;;  %s486_s9 = smov 0  }
   0x5   :  { %s488_s10 = smov 0   ;;  %s490_s11 = smov 0  }
   0x6 LB: > { %s266_s12 = sadd.s32 4294967295, %s464_s11   ;;  %s267_s13 = sadd.s32 4294967294, %s464_s11   ;;  %s464_s11 = sphi %s490_s11, %s17_s11   ;;  %s460_s10 = sphi %s488_s10, %s670_s10   ;;  %s456_s9 = sphi %s486_s9, %s669_s9   ;;  %s452_s8 = sphi %s484_s8, %s668_s8   ;;  %s448_s7 = sphi %s482_s7, %s667_s7   ;;  %s444_s6 = sphi %s480_s6, %s666_s6  }
   0x7   : > { %s29_s14 = sadd.s32 1, %s460_s10  ;;  %s38_s15 = sadd.s32 1, %s452_s8 }
   0x8   : > { %p31_p0 = scmp.ge.s32.totalorder %s29_s14, 2  ;;  %p45_p1 = scmp.ne.s32.totalorder %s452_s8, %s448_s7 }
   0x9   : > { %p46_p2 = scmp.eq.s32.totalorder %s464_s11, 0  ;;  %p51_p3 = scmp.ne.s32.totalorder %s448_s7, %s444_s6 }
   0xa   : > { %s672_s14 = smov (%p31_p0, %s29_s14), 0  ;;  %p52_p5 = scmp.eq.s32.totalorder %s266_s12, 0 }
   0xb   : > { %p521_p4 = por %p46_p2, %p45_p1  ;;  %s33_s17 = ssub.s32 %s460_s10, %s672_s14 }
   0xc   : > { %p77_p6 = scmp.eq.s32.totalorder %s266_s12, 1  ;;  %p36_p7 = scmp.eq.s32.totalorder %s33_s17, 0 }
   0xd   : > { %p527_p8 = por %p52_p5, %p51_p3  ;;  %p83_p10 = scmp.eq.s32.totalorder %s267_s13, 1 }
   0xe   : > { %p531_p9 = por %p77_p6, %p45_p1  ;;  %p296_p13 = scmp.lt.s32.totalorder %s464_s11, 2 }
   0xf   : > { %s536_s20 = scalar_select %p36_p7, %s452_s8, %s38_s15  }
  0x10   : > { %s659_s19 = scalar_select %p531_p9, 1, 0 }
  0x11   : > { %p538_p11 = por %p83_p10, %p51_p3  ;;  %s103_s22 = sand.u32 1, %s452_s8  }
  0x12   : > { %s270_s23 = sshll.u32 %s103_s22, 4  ;;  %s282_s24 = sshll.u32 %s460_s10, 8 }
  0x13   : > { %s660_s21 = scalar_select %p538_p11, 1, 0 }
  0x14   : > { %s549_s27 = scalar_lea.hbm %s654_s0, %s282_s24  ;;  %s107_s28 = scalar_lea.vmem [#allocation2], %s270_s23 }
  0x15   : > { %s116_s29 = sshll.u32 %s107_s28, 4  ;;  %p555_p0 = pnand %p296_p13, %p521_p4  ;;  %s551_s29 = int_to_ptr.vmem [resolvable:$true] %s116_s29 }
  0x16   : > { %s560_s2 = scalar_lea.sflag [#allocation3], %s103_s22  ;;  %s352_s3 = scalar_lea.hbm %s549_s27, 256 }
  0x17   : > { %p353_p2 = scmp.ne.s32.totalorder %s549_s27, %s352_s3  ;;  %p354_p3 = pneg %p555_p0 }
  0x18   : > { %s357_s12 = scalar_lea.hbm %s654_s0, 512  ;;  %p358_p4 = scmp.lt.u32.totalorder %s549_s27, %s654_s0 }
  0x19   : > { %p355_p5 = pnand %p354_p3, %p353_p2  ;;  %p359_p7 = scmp.lt.u32.totalorder %s357_s12, %s352_s3 }
  0x1a   : > { %p361_p13 = scmp.lt.u32.totalorder %s352_s3, %s549_s27 }
  0x1b   : > { %p356_p6 = pneg %p355_p5  ;;  %p360_p10 = por %p359_p7, %p358_p4 }
  0x1d   : > { %p362_p12 = por %p361_p13, %p360_p10 }
  0x1f   : > { %p363_p1 = pnand %p362_p12, %p356_p6 }
  0x21   : > { %366 = shalt.err (!%p363_p1)
}
  0x22   : > { %s367_s16 = scalar_lea.vmem %s551_s29, 256  ;;  %s466_s17 = smov [#allocation2]  }
  0x23   : > { %p368_p2 = scmp.ne.s32.totalorder %s551_s29, %s367_s16  ;;  %s372_s22 = sshll.u32 %s466_s17, 4  ;;  %s373_s22 = int_to_ptr.vmem [resolvable:$false] %s372_s22 }
  0x24   : > { %s374_s23 = scalar_lea.vmem %s373_s22, 512  ;;  %p375_p9 = scmp.lt.s32.totalorder %s551_s29, %s373_s22 }
  0x25   : > { %p370_p5 = pnand %p368_p2, %p354_p3  ;;  %p376_p4 = scmp.lt.s32.totalorder %s374_s23, %s367_s16 }
  0x27   : > { %p371_p11 = pneg %p370_p5  ;;  %p377_p7 = por %p376_p4, %p375_p9 }
  0x29   : > { %p378_p10 = pnand %p377_p7, %p371_p11 }
  0x2b   : > { %381 = shalt.err (!%p378_p10)
}
  0x2c   : > { %s467_s24 = smov 128   ;;  %s468_s25 = smov 8  }
  0x2d   : > { %291 = dma.hbm_to_vmem [thread:$0]  (!%p555_p0), %s549_s27, 256, %s551_s29, %s560_s2, %s467_s24, %s467_s24, %s468_s25  }
  0x2e   : > { %p124_p12 = scmp.lt.s32.totalorder %s464_s11, 3  ;;  %p662_p1 = scmp.ge.s32.totalorder %s464_s11, 1 }
  0x30   : > { %p125_p3 = pnand %p662_p1, %p124_p12 }
  0x31   : > { %s592_s26 = sand.u32 (!%p125_p3), 1, %s448_s7  }
  0x32   : > { %128 = sbr.rel (%p125_p3) target bundleno = 92 (0x5c), region = 24  ;;  %s274_s28 = sshll.u32 (!%p125_p3), %s592_s26, 4 }
  0x33   : > { %s131_s3 = scalar_lea.sflag (!%p125_p3), [#allocation3], %s592_s26  ;;  %s134_s4 = scalar_lea.vmem (!%p125_p3), [#allocation2], %s274_s28 }
  0x39   : > { %435 = dma.done.wait (%p527_p8), %s131_s3, 256  }
  0x3a   : > { %437 = vsyncadd (%p527_p8), %s131_s3, 4294967040  ;;  %v276_v0 = vld [vmem:[%s134_s4 + $0x8] sm:$0xff]  ;;  %v155_v2 = vld [vmem:[%s134_s4] sm:$0xff]  ;;  %s275_s27 = sshll.u32 %s592_s26, 3  ;;  %s283_s2 = sshll.u32 %s456_s9, 7 }
  0x3b   : > { %v158_v1 = vmul.f32 0.5, %v276_v0  ;;  %s152_s29 = scalar_lea.vmem [#allocation5], %s275_s27  ;;  %s607_s12 = scalar_lea.hbm %s655_s1, %s283_s2 }
  0x3c   : > { %s182_s30 = sshll.u32 %s152_s29, 4  ;;  %s166_s13 = scalar_lea.sflag [#allocation4], %s592_s26  ;;  %s602_s30 = int_to_ptr.vmem [resolvable:$true] %s182_s30 }
  0x3d   : > { %348 = vtanh.f32 %v158_v1  ;;  %s382_s15 = scalar_lea.vmem %s602_s30, 128  ;;  %p663_p9 = scmp.ne.s32.totalorder %s659_s19, 0 }
  0x3e   : > { %350 = vtanh.f32 %v155_v2  ;;  %p383_p8 = scmp.ne.s32.totalorder %s602_s30, %s382_s15  ;;  %s469_s9 = smov [#allocation5]  }
  0x3f   : > { %s386_s16 = sshll.u32 %s469_s9, 4  ;;  %s387_s16 = int_to_ptr.vmem [resolvable:$false] %s386_s16 }
  0x40   : > { %p384_p11 = pnand %p383_p8, %p663_p9  ;;  %s388_s17 = scalar_lea.vmem %s387_s16, 256 }
  0x41   : > { %p389_p6 = scmp.lt.s32.totalorder %s602_s30, %s387_s16  ;;  %p390_p13 = scmp.lt.s32.totalorder %s388_s17, %s382_s15 }
  0x42   : > { %p385_p0 = pneg %p384_p11 }
  0x43   : > { %p391_p2 = por %p390_p13, %p389_p6 }
  0x45   : > { %p392_p5 = pnand %p391_p2, %p385_p0 }
  0x47   : > { %v349_v3 = vpop.eup %348 }
  0x48   : > { %v160_v4 = vmul.f32 0.5, %v349_v3  ;;  %v351_v5 = vpop.eup %350 }
  0x4a   : > { %v161_v6 = vadd.f32 0.5, %v160_v4 }
  0x4c   : > { %v163_v7 = vmul.f32 %v351_v5, %v161_v6 }
  0x4e   : > { %164 = vst [vmem:[%s152_s29] sm:$0xff] %v163_v7 }
  0x4f   : > { %395 = shalt.err (!%p392_p5)
}
  0x50   : > { %s396_s22 = scalar_lea.hbm %s607_s12, 128  ;;  %s400_s25 = scalar_lea.hbm %s655_s1, 256 }
  0x51   : > { %p397_p4 = scmp.ne.s32.totalorder %s607_s12, %s396_s22  ;;  %p401_p12 = scmp.lt.u32.totalorder %s607_s12, %s655_s1 }
  0x52   : > { %p402_p1 = scmp.lt.u32.totalorder %s400_s25, %s396_s22  ;;  %p404_p8 = scmp.lt.u32.totalorder %s396_s22, %s607_s12 }
  0x53   : > { %p398_p7 = pnand %p397_p4, %p663_p9 }
  0x54   : > { %p403_p3 = por %p402_p1, %p401_p12 }
  0x55   : > { %p399_p10 = pneg %p398_p7 }
  0x56   : > { %p405_p11 = por %p404_p8, %p403_p3 }
  0x58   : > { %p406_p0 = pnand %p405_p11, %p399_p10 }
  0x5a   : > { %409 = shalt.err (!%p406_p0)
}
  0x5b   : > { %286 = dma.vmem_to_hbm [thread:$0]  (%p663_p9), %s602_s30, 128, %s607_s12, %s166_s13  }
  0x5c PF: > { %s194_s3 = sand.u32 1, %s444_s6   ;;  %p664_p6 = scmp.ne.s32.totalorder %s660_s21, 0 }
  0x5d   : > { %p665_p13 = scmp.ge.s32.totalorder %s464_s11, 2  ;;  %s195_s4 = scalar_lea.sflag [#allocation4], %s194_s3 }
  0x5f   : > { %p293_p2 = pnand %p665_p13, %p664_p6 }
  0x61   : > { %439 = dma.done.wait (!%p293_p2), %s195_s4, 128  }
  0x62   : > { %441 = vsyncadd (!%p293_p2), %s195_s4, 4294967168  ;;  %s17_s11 = sadd.s32 1, %s464_s11   ;;  %s666_s6 = smov %s448_s7 }
  0x63   : > { %p14_p5 = scmp.ge.s32.totalorder %s17_s11, 4   ;;  %s667_s7 = smov %s452_s8 }
  0x64   : > { %s668_s8 = smov %s536_s20  ;;  %s669_s9 = smov %s460_s10 }
  0x65   : > { %s670_s10 = smov %s672_s14  ;;  %16 = sbr.rel (!%p14_p5) target bundleno = 6 (0x6), region = 70 }
  0x6c   :  { %200 = vsyncpa [#allocation3], 1 }
  0x6d   :  { %202 = vsyncpa [#allocation3 + $0x1], 1 }
  0x6e   :  { %203 = vsyncpa [#allocation4], 1 }
  0x6f   :  { %205 = vsyncpa [#allocation4 + $0x1], 1 }

</bundles_post_ra>
